<compile_context>
chip_gen: v5e
topology: v5e:2x2
jax: 0.10.0
libtpu: 0.0.40
codegen_flags: <defaults>
</compile_context>

<pallas_src>
import functools
import math

import jax
import jax.numpy as jnp
from jax.experimental import pallas as pl
from jax.experimental.pallas import tpu as pltpu


def _round_up(x, m):
    return (x + m - 1) // m * m


def _nbytes(shape, dtype):
    return math.prod(shape) * jnp.dtype(dtype).itemsize


def _vmem_capacity_bytes():
    """Physical VMEM per TensorCore (v5e/v6e: 128 MiB, v7x: 64 MiB)."""
    try:
        info = pltpu.get_tpu_info()
        for attr in ("vmem_capacity_bytes", "vmem_size_bytes", "vmem_bytes"):
            v = getattr(info, attr, None)
            if v:
                return int(v)
    except Exception:
        pass
    return 64 << 20  # conservative fallback (v7x-sized VMEM)


def _mlp_kernel(x_ref, w1_ref, b1_ref, w2_ref, b2_ref, o_ref, acc_ref, *, precision):
    """One (seq_tile, i_tile) grid step of the fused MLP.

    x_ref  : (TS, Hp)      activation tile (resident across the i axis)
    w1_ref : (Hp, TI)      streamed slice of dense_h_to_4h weight
    b1_ref : (1, TI)       slice of dense_h_to_4h bias (f32)
    w2_ref : (TI, Hp)      streamed slice of dense_4h_to_h weight
    b2_ref : (1, Hp)       dense_4h_to_h bias (f32, applied once at finalize)
    o_ref  : (TS, Hp)      output tile (same block index across the i axis)
    acc_ref: (TS, Hp) f32  VMEM accumulator
    """
    i = pl.program_id(1)

    @pl.when(i == 0)
    def _init():
        acc_ref[...] = jnp.zeros_like(acc_ref)

    # First projection slice: (TS, Hp) @ (Hp, TI) -> f32 on the MXU.
    h = jnp.dot(x_ref[...], w1_ref[...],
                preferred_element_type=jnp.float32, precision=precision)
    h = h + b1_ref[...]
    # tanh-approximate GELU == torch.nn.functional.gelu(..., approximate='tanh')
    h = jax.nn.gelu(h, approximate=True)
    # Second projection partial sum: (TS, TI) @ (TI, Hp), accumulate in f32.
    acc_ref[...] += jnp.dot(h.astype(w2_ref.dtype), w2_ref[...],
                            preferred_element_type=jnp.float32, precision=precision)

    @pl.when(i == pl.num_programs(1) - 1)
    def _finalize():
        o_ref[...] = (acc_ref[...] + b2_ref[...]).astype(o_ref.dtype)


def flash_mlp(x, w1, b1, w2, b2, *, seq_tile=512, inter_tile=512,
              compute_dtype=None, precision=None):
    """Fused FlashMLP forward.

    x : (S, H); w1: (H, I); b1: (I,); w2: (I, H); b2: (H,)
    Weights are stored (in_features, out_features), matching FastLinear after
    transpose_weight() (torch.addmm(bias, input, weight)).

    For peak throughput pass compute_dtype=jnp.bfloat16 (bf16 MXU operands,
    f32 accumulation); with f32 operands the MXU matmul uses Precision.HIGHEST
    for parity with the PyTorch reference.
    """
    S, H = x.shape
    I = w1.shape[1]
    out_dtype = x.dtype

    if compute_dtype is not None:
        x = x.astype(compute_dtype)
        w1 = w1.astype(compute_dtype)
        w2 = w2.astype(compute_dtype)
    mm_dtype = x.dtype
    if precision is None:
        precision = (jax.lax.Precision.HIGHEST
                     if jnp.dtype(mm_dtype) == jnp.dtype(jnp.float32)
                     else jax.lax.Precision.DEFAULT)
    # Biases stay f32; they are added onto the f32 MXU accumulators.
    b1 = b1.astype(jnp.float32)
    b2 = b2.astype(jnp.float32)

    # --- lane-dense hidden / intermediate padding ----------------------------
    Hp = _round_up(H, 128)      # hidden/output dim: multiple of 128 (unmasked vst)
    Ip = _round_up(I, 128)      # intermediate dim: 128-rounded; ti divides Ip

    # --- tile sizes -----------------------------------------------------------
    row_mult = 16 if jnp.dtype(mm_dtype).itemsize == 2 else 8
    ts = min(max(seq_tile, row_mult), _round_up(S, row_mult))
    # MXU prefers 128-multiples on the M axis; only bump when S is big enough.
    ts = _round_up(ts, 128) if ts >= 128 else _round_up(ts, row_mult)

    # ti: largest multiple of 128 that divides Ip and is <= requested inter_tile,
    # so no dead padded intermediate columns beyond the 128-rounding.
    ti_candidates = sorted(c for c in range(128, Ip + 1, 128) if Ip % c == 0)
    req_ti = max(128, _round_up(min(inter_tile, Ip), 128))
    ti = max(c for c in ti_candidates if c <= req_ti)

    # --- VMEM-aware tile shrink (double-buffered inputs/outputs + f32 acc) ----
    def _footprint(ts_, ti_):
        return (2 * (_nbytes((ts_, Hp), mm_dtype)        # x tile
                     + _nbytes((Hp, ti_), mm_dtype)      # w1 slice
                     + _nbytes((1, ti_), jnp.float32)    # b1 slice
                     + _nbytes((ti_, Hp), mm_dtype)      # w2 slice
                     + _nbytes((1, Hp), jnp.float32)     # b2
                     + _nbytes((ts_, Hp), out_dtype))    # out tile
                + _nbytes((ts_, Hp), jnp.float32))       # accumulator scratch

    vmem_cap = int(_vmem_capacity_bytes() * 0.85)        # leave Mosaic scratch headroom
    while _footprint(ts, ti) > vmem_cap:
        smaller_ti = [c for c in ti_candidates if c < ti]
        if smaller_ti:
            ti = smaller_ti[-1]
        elif ts >= 2 * 128:
            ts //= 2
        else:
            break

    # --- megacore: ensure >=2 parallel seq tiles when the sequence allows it --
    while _round_up(S, ts) // ts < 2 and ts >= 2 * 128:
        ts //= 2

    Sp = _round_up(S, ts)

    # --- pad only when needed (pre-pad weights at load time in production) ----
    xp = jnp.pad(x, ((0, Sp - S), (0, Hp - H))) if (Sp != S or Hp != H) else x
    w1p = jnp.pad(w1, ((0, Hp - H), (0, Ip - I))) if (Hp != H or Ip != I) else w1
    b1p = (jnp.pad(b1, (0, Ip - I)) if Ip != I else b1).reshape(1, Ip)
    w2p = jnp.pad(w2, ((0, Ip - I), (0, Hp - H))) if (Hp != H or Ip != I) else w2
    b2p = (jnp.pad(b2, (0, Hp - H)) if Hp != H else b2).reshape(1, Hp)

    grid = (Sp // ts, Ip // ti)

    out = pl.pallas_call(
        functools.partial(_mlp_kernel, precision=precision),
        out_shape=jax.ShapeDtypeStruct((Sp, Hp), out_dtype),
        grid_spec=pltpu.PrefetchScalarGridSpec(
            num_scalar_prefetch=0,
            grid=grid,
            in_specs=[
                pl.BlockSpec((ts, Hp), lambda s, i: (s, 0)),   # x (resident over i)
                pl.BlockSpec((Hp, ti), lambda s, i: (0, i)),   # w1 slice (streamed)
                pl.BlockSpec((1, ti), lambda s, i: (0, i)),    # b1 slice
                pl.BlockSpec((ti, Hp), lambda s, i: (i, 0)),   # w2 slice (streamed)
                pl.BlockSpec((1, Hp), lambda s, i: (0, 0)),    # b2 (constant)
            ],
            out_specs=pl.BlockSpec((ts, Hp), lambda s, i: (s, 0)),
            scratch_shapes=[pltpu.VMEM((ts, Hp), jnp.float32)],
        ),
        compiler_params=pltpu.CompilerParams(
            dimension_semantics=("parallel", "arbitrary"),
            vmem_limit_bytes=vmem_cap,
        ),
    )(xp, w1p, b1p, w2p, b2p)

    if Sp != S or Hp != H:
        out = out[:S, :H]
    return out


def _reference(x, w1, b1, w2, b2):
    h = x.astype(jnp.float32) @ w1.astype(jnp.float32) + b1.astype(jnp.float32)
    h = jax.nn.gelu(h, approximate=True)
    return h @ w2.astype(jnp.float32) + b2.astype(jnp.float32)


def _make_params(key, S, H, I, dtype=jnp.float32):
    kx, kw1, kb1, kw2, kb2 = jax.random.split(key, 5)
    x = jax.random.normal(kx, (S, H), dtype)
    w1 = jax.random.uniform(kw1, (H, I), dtype, minval=-1.0, maxval=1.0) / jnp.sqrt(H)
    b1 = jax.random.uniform(kb1, (I,), dtype, minval=-1.0, maxval=1.0) / jnp.sqrt(H)
    w2 = jax.random.uniform(kw2, (I, H), dtype, minval=-1.0, maxval=1.0) / jnp.sqrt(I)
    b2 = jax.random.uniform(kb2, (H,), dtype, minval=-1.0, maxval=1.0) / jnp.sqrt(I)
    return x, w1, b1, w2, b2


if __name__ == "__main__":
    key = jax.random.PRNGKey(0)
    k1, k2, k3 = jax.random.split(key, 3)

    # Case 1: 128-aligned shapes, small tiles so the grid exercises both axes
    # (2 seq tiles x 4 reduction steps: init / accumulate / finalize paths).
    S, H, I = 16, 128, 512
    x, w1, b1, w2, b2 = _make_params(k1, S, H, I)
    out = jax.block_until_ready(flash_mlp(x, w1, b1, w2, b2,
                                          seq_tile=8, inter_tile=128))
    ref = _reference(x, w1, b1, w2, b2)
    assert out.shape == (S, H)
    assert jnp.allclose(out, ref, rtol=1e-5, atol=1e-5), "f32 tiled mismatch"

    # Case 2: tiny unaligned shapes (seq=8, hidden=32, 4*hidden=128) exercising
    # the lane-dense padding path with default (large) tiles.
    S2, H2, I2 = 8, 32, 128
    x2, w12, b12, w22, b22 = _make_params(k2, S2, H2, I2)
    out2 = jax.block_until_ready(flash_mlp(x2, w12, b12, w22, b22))
    ref2 = _reference(x2, w12, b12, w22, b22)
    assert out2.shape == (S2, H2)
    assert jnp.allclose(out2, ref2, rtol=1e-5, atol=1e-5), "padded-path mismatch"

    # Case 3: bf16 MXU operands with f32 accumulation (looser tolerance).
    out3 = jax.block_until_ready(
        flash_mlp(x, w1, b1, w2, b2, seq_tile=8, inter_tile=128,
                  compute_dtype=jnp.bfloat16))
    assert out3.shape == (S, H)
    assert jnp.allclose(out3, ref, rtol=5e-2, atol=5e-2), "bf16 mismatch"

    # Case 4: intermediate dim not a multiple of the tile (I=300 -> Ip=384,
    # ti=128, 3 reduction steps with a zero-padded tail tile).
    S4, H4, I4 = 16, 64, 300
    x4, w14, b14, w24, b24 = _make_params(k3, S4, H4, I4)
    out4 = jax.block_until_ready(flash_mlp(x4, w14, b14, w24, b24, inter_tile=128))
    ref4 = _reference(x4, w14, b14, w24, b24)
    assert out4.shape == (S4, H4)
    assert jnp.allclose(out4, ref4, rtol=1e-5, atol=1e-5), "tail-tile mismatch"

    print("KERNEL_OK")
</pallas_src>

<mosaic_0001>
module attributes {stable_mosaic.version = 11 : i64} {
  func.func @_mlp_kernel(%arg0: i32, %arg1: i32, %arg2: memref<8x128xf32, #tpu.memory_space<vmem>>, %arg3: memref<128x128xf32, #tpu.memory_space<vmem>>, %arg4: memref<1x128xf32, #tpu.memory_space<vmem>>, %arg5: memref<128x128xf32, #tpu.memory_space<vmem>>, %arg6: memref<1x128xf32, #tpu.memory_space<vmem>>, %arg7: memref<8x128xf32, #tpu.memory_space<vmem>>, %arg8: memref<8x128xf32, #tpu.memory_space<vmem>>) attributes {dimension_semantics = [#tpu.dimension_semantics<parallel>, #tpu.dimension_semantics<arbitrary>], iteration_bounds = array<i64: 2, 4>, scalar_prefetch = 0 : i64, scratch_operands = 1 : i64, tpu.core_type = #tpu.core_type<tc>, window_params = [{transform_indices = @transform_0, window_bounds = array<i64: 8, 128>}, {transform_indices = @transform_1, window_bounds = array<i64: 128, 128>}, {transform_indices = @transform_2, window_bounds = array<i64: 1, 128>}, {transform_indices = @transform_3, window_bounds = array<i64: 128, 128>}, {pipeline_mode = #tpu.pipeline_mode<synchronous>, transform_indices = @transform_4, window_bounds = array<i64: 1, 128>}, {transform_indices = @transform_5, window_bounds = array<i64: 8, 128>}]} {
    %c0_i32 = arith.constant 0 : i32
    %0 = arith.cmpi eq, %arg1, %c0_i32 : i32
    %1 = arith.extui %0 : i1 to i32
    %c0_i32_0 = arith.constant 0 : i32
    %2 = arith.cmpi ne, %1, %c0_i32_0 : i32
    scf.if %2 {
      %cst_18 = arith.constant 0.000000e+00 : f32
      %30 = vector.broadcast %cst_18 : f32 to vector<8x128xf32>
      %c0_19 = arith.constant 0 : index
      %c0_20 = arith.constant 0 : index
      %31 = vector.load %arg8[%c0_19, %c0_20] : memref<8x128xf32, #tpu.memory_space<vmem>>, vector<8x128xf32>
      tpu.vector_store %arg8[%c0_19, %c0_20], %30 {strides = array<i32>} : memref<8x128xf32, #tpu.memory_space<vmem>>, vector<8x128xf32>,
    } else {
    }
    %c0 = arith.constant 0 : index
    %c0_1 = arith.constant 0 : index
    %3 = vector.load %arg2[%c0, %c0_1] : memref<8x128xf32, #tpu.memory_space<vmem>>, vector<8x128xf32>
    %c0_2 = arith.constant 0 : index
    %c0_3 = arith.constant 0 : index
    %4 = vector.load %arg3[%c0_2, %c0_3] : memref<128x128xf32, #tpu.memory_space<vmem>>, vector<128x128xf32>
    %cst = arith.constant dense<0.000000e+00> : vector<8x128xf32>
    %5 = tpu.matmul %3, %4, %cst {dimension_numbers = #tpu.dot_dimension_numbers<[1], [0], [0], [1], [0, 0, 1, 1], [], []>, precision = #tpu.contract_precision<fp32>} : vector<8x128xf32>, vector<128x128xf32>, vector<8x128xf32> -> vector<8x128xf32>
    %c0_4 = arith.constant 0 : index
    %c0_5 = arith.constant 0 : index
    %6 = vector.load %arg4[%c0_4, %c0_5] : memref<1x128xf32, #tpu.memory_space<vmem>>, vector<1x128xf32>
    %7 = vector.broadcast %6 : vector<1x128xf32> to vector<8x128xf32>
    %8 = arith.addf %5, %7 : vector<8x128xf32>
    %9 = arith.mulf %8, %8 : vector<8x128xf32>
    %10 = arith.mulf %8, %9 : vector<8x128xf32>
    %cst_6 = arith.constant 4.471500e-02 : f32
    %11 = vector.broadcast %cst_6 : f32 to vector<8x128xf32>
    %12 = arith.mulf %11, %10 : vector<8x128xf32>
    %13 = arith.addf %8, %12 : vector<8x128xf32>
    %cst_7 = arith.constant 0.797884583 : f32
    %14 = vector.broadcast %cst_7 : f32 to vector<8x128xf32>
    %15 = arith.mulf %14, %13 : vector<8x128xf32>
    %16 = math.tanh %15 : vector<8x128xf32>
    %cst_8 = arith.constant 1.000000e+00 : f32
    %17 = vector.broadcast %cst_8 : f32 to vector<8x128xf32>
    %18 = arith.addf %17, %16 : vector<8x128xf32>
    %cst_9 = arith.constant 5.000000e-01 : f32
    %19 = vector.broadcast %cst_9 : f32 to vector<8x128xf32>
    %20 = arith.mulf %19, %18 : vector<8x128xf32>
    %21 = arith.mulf %8, %20 : vector<8x128xf32>
    %c0_10 = arith.constant 0 : index
    %c0_11 = arith.constant 0 : index
    %22 = vector.load %arg8[%c0_10, %c0_11] : memref<8x128xf32, #tpu.memory_space<vmem>>, vector<8x128xf32>
    %c0_12 = arith.constant 0 : index
    %c0_13 = arith.constant 0 : index
    %23 = vector.load %arg5[%c0_12, %c0_13] : memref<128x128xf32, #tpu.memory_space<vmem>>, vector<128x128xf32>
    %cst_14 = arith.constant dense<0.000000e+00> : vector<8x128xf32>
    %24 = tpu.matmul %21, %23, %cst_14 {dimension_numbers = #tpu.dot_dimension_numbers<[1], [0], [0], [1], [0, 0, 1, 1], [], []>, precision = #tpu.contract_precision<fp32>} : vector<8x128xf32>, vector<128x128xf32>, vector<8x128xf32> -> vector<8x128xf32>
    %25 = arith.addf %22, %24 : vector<8x128xf32>
    %c0_15 = arith.constant 0 : index
    %c0_16 = arith.constant 0 : index
    %26 = vector.load %arg8[%c0_15, %c0_16] : memref<8x128xf32, #tpu.memory_space<vmem>>, vector<8x128xf32>
    tpu.vector_store %arg8[%c0_15, %c0_16], %25 {strides = array<i32>} : memref<8x128xf32, #tpu.memory_space<vmem>>, vector<8x128xf32>,
    %c3_i32 = arith.constant 3 : i32
    %27 = arith.cmpi eq, %arg1, %c3_i32 : i32
    %28 = arith.extui %27 : i1 to i32
    %c0_i32_17 = arith.constant 0 : i32
    %29 = arith.cmpi ne, %28, %c0_i32_17 : i32
    scf.if %29 {
      %c0_18 = arith.constant 0 : index
      %c0_19 = arith.constant 0 : index
      %30 = vector.load %arg8[%c0_18, %c0_19] : memref<8x128xf32, #tpu.memory_space<vmem>>, vector<8x128xf32>
      %c0_20 = arith.constant 0 : index
      %c0_21 = arith.constant 0 : index
      %31 = vector.load %arg6[%c0_20, %c0_21] : memref<1x128xf32, #tpu.memory_space<vmem>>, vector<1x128xf32>
      %32 = vector.broadcast %31 : vector<1x128xf32> to vector<8x128xf32>
      %33 = arith.addf %30, %32 : vector<8x128xf32>
      %c0_22 = arith.constant 0 : index
      %c0_23 = arith.constant 0 : index
      %34 = vector.load %arg7[%c0_22, %c0_23] : memref<8x128xf32, #tpu.memory_space<vmem>>, vector<8x128xf32>
      tpu.vector_store %arg7[%c0_22, %c0_23], %33 {strides = array<i32>} : memref<8x128xf32, #tpu.memory_space<vmem>>, vector<8x128xf32>,
    } else {
    }
    return
  }
  func.func @transform_0(%arg0: i32, %arg1: i32) -> (i32, i32) {
    %c0_i32 = arith.constant 0 : i32
    %c0_i32_0 = arith.constant 0 : i32
    return %arg0, %c0_i32 : i32, i32
  }
  func.func @transform_1(%arg0: i32, %arg1: i32) -> (i32, i32) {
    %c0_i32 = arith.constant 0 : i32
    %c0_i32_0 = arith.constant 0 : i32
    return %c0_i32, %arg1 : i32, i32
  }
  func.func @transform_2(%arg0: i32, %arg1: i32) -> (i32, i32) {
    %c0_i32 = arith.constant 0 : i32
    %c0_i32_0 = arith.constant 0 : i32
    return %c0_i32, %arg1 : i32, i32
  }
  func.func @transform_3(%arg0: i32, %arg1: i32) -> (i32, i32) {
    %c0_i32 = arith.constant 0 : i32
    %c0_i32_0 = arith.constant 0 : i32
    return %arg1, %c0_i32 : i32, i32
  }
  func.func @transform_4(%arg0: i32, %arg1: i32) -> (i32, i32) {
    %c0_i32 = arith.constant 0 : i32
    %c0_i32_0 = arith.constant 0 : i32
    %c0_i32_1 = arith.constant 0 : i32
    return %c0_i32, %c0_i32_0 : i32, i32
  }
  func.func @transform_5(%arg0: i32, %arg1: i32) -> (i32, i32) {
    %c0_i32 = arith.constant 0 : i32
    %c0_i32_0 = arith.constant 0 : i32
    return %arg0, %c0_i32 : i32, i32
  }
}

</mosaic_0001>

<bundles_post_ra>
// kernel: tpu_custom_call.1
= control target key start
LH: loop header
LB: loop body
LE: loop exit
PB: predicated region body
PF: predicated region fallthrough
CT: control target
= control target key end

     0   :  { %s2480_s0 = inlined_call_operand.hbm [shape: f32[16,128], index: 0, kind: input, shape index: {}]   ;;  %s2481_s1 = inlined_call_operand.hbm [shape: f32[128,512], index: 1, kind: input, shape index: {}]   ;;  %s2482_s2 = inlined_call_operand.hbm [shape: f32[1,512], index: 2, kind: input, shape index: {}]   ;;  %s2483_s3 = inlined_call_operand.hbm [shape: f32[512,128], index: 3, kind: input, shape index: {}]   ;;  %s2484_s4 = inlined_call_operand.vmem [shape: f32[1,128], index: 4, kind: input, shape index: {}]   ;;  %s2485_s5 = inlined_call_operand.hbm [shape: f32[16,128], index: 5, kind: output, shape index: {}]  }
   0x1   :  { %2498 = sst [smem:[#allocation26_spill]] %s2480_s0 }
   0x2   :  { %2499 = sst [smem:[#allocation27_spill]] %s2481_s1 }
   0x3   :  { %2500 = sst [smem:[#allocation28_spill]] %s2484_s4 }
   0x4   :  { %2501 = sst [smem:[#allocation29_spill]] %s2485_s5 }
   0x5   :  { %10 = vsyncpa [#allocation4], 0 }
   0x6   :  { %12 = vsyncpa [#allocation4 + $0x1], 0 }
   0x7   :  { %13 = vsyncpa [#allocation7], 0 }
   0x8   :  { %15 = vsyncpa [#allocation7 + $0x1], 0 }
   0x9   :  { %16 = vsyncpa [#allocation10], 0 }
   0xa   :  { %18 = vsyncpa [#allocation10 + $0x1], 0 }
   0xb   :  { %19 = vsyncpa [#allocation5], 0 }
   0xc   :  { %21 = vsyncpa [#allocation5 + $0x1], 0  ;;  %s1710_s18 = smov 0   ;;  %s1712_s19 = smov 0  }
   0xd   :  { %s1714_s20 = smov 0   ;;  %s1716_s21 = smov 0  }
   0xe   :  { %s1718_s22 = smov 0   ;;  %s1720_s23 = smov 0  }
   0xf   :  { %s1722_s24 = smov 0   ;;  %s1724_s25 = smov 0  }
  0x10   :  { %s1726_s26 = smov 0   ;;  %s1728_s27 = smov 0  }
  0x11   :  { %s1730_s28 = smov 0  }
  0x12 LB: > { %2502 = sst [smem:[#allocation16_spill]] %s1642_s20  ;;  %p54_p0 = scmp.eq.s32.totalorder %s1674_s28, 0  ;;  %s1674_s28 = sphi %s1730_s28, %s27_s28   ;;  %s1670_s27 = sphi %s1728_s27, %s2538_s27   ;;  %s1666_s26 = sphi %s1726_s26, %s2544_s26   ;;  %s1662_s25 = sphi %s1724_s25, %s2536_s25   ;;  %s1658_s24 = sphi %s1722_s24, %s2543_s24   ;;  %s1654_s23 = sphi %s1720_s23, %s2535_s23   ;;  %s1650_s22 = sphi %s1718_s22, %s2542_s22   ;;  %s1646_s21 = sphi %s1716_s21, %s2541_s21   ;;  %s1642_s20 = sphi %s1714_s20, %s2533_s20   ;;  %s1638_s19 = sphi %s1712_s19, %s2540_s19   ;;  %s1634_s18 = sphi %s1710_s18, %s2539_s18  }
  0x13   : > { %2503 = sst [smem:[#allocation17_spill]] %s1646_s21  ;;  %p79_p1 = scmp.ne.s32.totalorder %s1642_s20, %s1638_s19 }
  0x14   : > { %2504 = sst [smem:[#allocation18_spill]] %s1654_s23  ;;  %p2491_p2 = scmp.lt.s32.totalorder %s1674_s28, 8 }
  0x15   : > { %2505 = sst [smem:[#allocation19_spill]] %s1662_s25  ;;  %s230_s30 = sand.u32 1, %s1674_s28  }
  0x16   : > { %2506 = sst [smem:[#allocation20_spill]] %s1670_s27  ;;  %p81_p3 = por %p79_p1, %p54_p0 }
  0x17   : > { %s1774_s6 = sand.u32 1, %s1642_s20   ;;  %s1283_s7 = sshll.u32 %s1666_s26, 3 }
  0x18   : > { %s2486_s8 = sshll.u32 %s1774_s6, 7  ;;  %s2507_s1 = sld [smem:[#allocation27_spill]] }
  0x19   : > { %s234_s13 = scalar_lea.vmem [#allocation6], %s2486_s8  ;;  %p1785_p4 = pnand %p2491_p2, %p81_p3 }
  0x1a   : > { %s241_s14 = sshll.u32 %s234_s13, 4  ;;  %s1789_s16 = scalar_lea.sflag [#allocation7], %s230_s30  ;;  %s242_s14 = int_to_ptr.vmem [resolvable:$true] %s241_s14 }
  0x1b   : > { %s1676_s17 = smov 512   ;;  %s2488_s9 = smov 8  }
  0x1c   : > { %p1287_p5 = scmp.ge.s32.totalorder %s1674_s28, 1  ;;  %p288_p6 = scmp.lt.s32.totalorder %s1674_s28, 9 }
  0x1d   : > { %s1803_s10 = sadd.s32 4294967295, %s1674_s28   ;;  %s36_s13 = sadd.s32 1, %s1666_s26 }
  0x1e   : > { %s238_s11 = scalar_lea.hbm %s2507_s1, %s1283_s7  ;;  %s2487_s7 = smov 128  }
  0x1f   : > { %s239_s12 = sshll.u32 %s238_s11, 4  ;;  %p1798_p7 = pnand %p1287_p5, %p288_p6  ;;  %s240_s12 = int_to_ptr.hbm [resolvable:$true] %s239_s12 }
  0x20   : > { %1315 = dma.hbm_to_vmem [thread:$0]  (!%p1785_p4), %s240_s12, 2048, %s242_s14, %s1789_s16, %s1676_s17, %s2487_s7, %s2488_s9  }
  0x21   : > { %s1277_s11 = sadd.s32 4294967294, %s1674_s28   ;;  %p37_p8 = scmp.ge.s32.totalorder %s36_s13, 4 }
  0x22   : > { %s39_s8 = sadd.s32 1, %s1670_s27  ;;  %s46_s12 = sadd.s32 1, %s1654_s23 }
  0x23   : > { %p53_p9 = scmp.ne.s32.totalorder %s1654_s23, %s1650_s22  ;;  %s2546_s13 = smov (%p37_p8, %s36_s13), 0 }
  0x24   : > { %2510 = sst [smem:[#allocation21_spill]] %s2546_s13  ;;  %s2548_s8 = smov (!%p37_p8, %s39_s8), %s1670_s27 }
  0x25   : > { %p1819_p10 = por %p54_p0, %p53_p9  ;;  %p59_p11 = scmp.ne.s32.totalorder %s1650_s22, %s1646_s21 }
  0x26   : > { %p41_p12 = scmp.ge.s32.totalorder %s2548_s8, 2  ;;  %p60_p13 = scmp.eq.s32.totalorder %s1803_s10, 0 }
  0x27   : > { %s69_s17 = ssub.s32 %s1666_s26, %s2546_s13  ;;  %p85_p1 = scmp.ne.s32.totalorder %s1638_s19, %s1634_s18 }
  0x28   : > { %s2550_s8 = smov (%p41_p12, %s2548_s8), 0  ;;  %p1835_p3 = por %p60_p13, %p59_p11 }
  0x29   : > { %2512 = sst [smem:[#allocation22_spill]] %s2550_s8  ;;  %p70_p0 = scmp.eq.s32.totalorder %s69_s17, 0 }
  0x2a   : > { %s43_s9 = ssub.s32 %s1670_s27, %s2550_s8  ;;  %p1841_p5 = por %p85_p1, %p60_p13 }
  0x2b   : > { %p44_p6 = scmp.eq.s32.totalorder %s43_s9, 0  ;;  %p182_p8 = scmp.eq.s32.totalorder %s1803_s10, 7 }
  0x2c   : > { %s2515_s1 = sadd.s32 1, %s1642_s20  ;;  %p188_p2 = scmp.eq.s32.totalorder %s1277_s11, 7 }
  0x2d   : > { %s1849_s18 = scalar_select %p70_p0, %s1642_s20, %s2515_s1  }
  0x2e   : > { %s1852_s13 = scalar_select %p44_p6, %s1654_s23, %s46_s12  }
  0x2f   : > { %2516 = sst [smem:[#allocation23_spill]] %s1849_s18  ;;  %p1857_p12 = por %p182_p8, %p53_p9 }
  0x30   : > { %2517 = sst [smem:[#allocation24_spill]] %s1852_s13  ;;  %s211_s17 = sand.u32 1, %s1654_s23  }
  0x31   : > { %s1281_s8 = sshll.u32 %s1670_s27, 3  ;;  %p1866_p13 = por %p188_p2, %p59_p11 }
  0x32   : > { %s1280_s25 = sshll.u32 %s211_s17, 3  ;;  %s2521_s0 = sld [smem:[#allocation26_spill]] }
  0x33   : > { %s2519_s9 = scalar_select %p1866_p13, 1, 0 }
  0x34   : > { %s215_s11 = scalar_lea.vmem [#allocation3], %s1280_s25  ;;  %p2522_p9 = scmp.lt.s32.totalorder %s1674_s28, 8 }
  0x35   : > { %2520 = sst [smem:[#allocation25_spill]] %s2519_s9  ;;  %s223_s23 = sshll.u32 %s215_s11, 4  ;;  %s224_s23 = int_to_ptr.vmem [resolvable:$true] %s223_s23 }
  0x36   : > { %p1310_p2 = pnand %p2522_p9, %p1819_p10  ;;  %s257_s20 = scalar_lea.hbm %s2482_s2, %s1666_s26 }
  0x37   : > { %s259_s9 = sshll.u32 %s257_s20, 4  ;;  %s212_s4 = scalar_lea.sflag [#allocation4], %s211_s17  ;;  %s260_s9 = int_to_ptr.hbm [resolvable:$true] %s259_s9 }
  0x38   : > { %s219_s12 = scalar_lea.hbm %s2521_s0, %s1281_s8  ;;  %s254_s8 = scalar_lea.vmem [#allocation8], %s1774_s6 }
  0x39   : > { %s221_s13 = sshll.u32 %s219_s12, 4  ;;  %s261_s1 = sshll.u32 %s254_s8, 4  ;;  %s222_s13 = int_to_ptr.hbm [resolvable:$true] %s221_s13  ;;  %s262_s1 = int_to_ptr.vmem [resolvable:$true] %s261_s1 }
  0x3a   : > { %1312 = dma.hbm_to_vmem [thread:$0]  (!%p1310_p2), %s222_s13, 128, %s224_s23, %s212_s4  }
  0x3b   : > { %1318 = dma.hbm_to_vmem [thread:$0]  (!%p1785_p4), %s260_s9, 16, %s262_s1, %s1789_s16  }
  0x3c   : > { %s1298_s25 = sshll.u32 %s1666_s26, 7  ;;  %s2523_s0 = sshll.u32 %s1774_s6, 7 }
  0x3d   : > { %s277_s11 = scalar_lea.hbm %s2483_s3, %s1298_s25  ;;  %s272_s21 = scalar_lea.vmem [#allocation9], %s2523_s0 }
  0x3e   : > { %s280_s27 = sshll.u32 %s272_s21, 4  ;;  %s278_s18 = sshll.u32 %s277_s11, 4  ;;  %s281_s27 = int_to_ptr.vmem [resolvable:$true] %s280_s27  ;;  %s279_s18 = int_to_ptr.hbm [resolvable:$true] %s278_s18 }
  0x3f   : > { %s269_s20 = scalar_lea.sflag [#allocation10], %s1774_s6  ;;  %s2524_s23 = smov 8  }
  0x40   : > { %s2525_s13 = smov 128   ;;  %292 = sbr.rel (%p1798_p7) target bundleno = 499 (0x1f3), region = 40 }
  0x41   : > { %1321 = dma.hbm_to_vmem [thread:$0]  (!%p1785_p4), %s279_s18, 2048, %s281_s27, %s269_s20, %s2525_s13, %s2525_s13, %s2524_s23  }
  0x42   : > { %s1900_s16 = sand.u32 (!%p1798_p7), 1, %s1650_s22  }
  0x43   : > { %s1288_s0 = sshll.u32 (!%p1798_p7), %s1900_s16, 3  ;;  %s295_s21 = scalar_lea.sflag (!%p1798_p7), [#allocation4], %s1900_s16 }
  0x44   : > { %s1904_s17 = scalar_lea.vmem (!%p1798_p7), [#allocation3], %s1288_s0 }
  0x45   : > { %1617 = dma.done.wait (%p1835_p3), %s295_s21, 128  }
  0x46   : > { %1619 = vsyncadd (%p1835_p3), %s295_s21, 4294967168  ;;  %s304_s6 = sand.u32 1, %s1803_s10   ;;  %s1912_s15 = sand.u32 1, %s1638_s19  }
  0x47   : > { %s1289_s30 = sshll.u32 %s1912_s15, 7  ;;  %s305_s9 = scalar_lea.sflag [#allocation7], %s304_s6 }
  0x48   : > { %s1915_s4 = scalar_lea.vmem [#allocation6], %s1289_s30 }
  0x49   : > { %1621 = dma.done.wait (%p1841_p5), %s305_s9, 2064  }
  0x4a   : > { %1623 = vsyncadd (%p1841_p5), %s305_s9, 4294965232  ;;  %s317_s7 = scalar_lea.vmem [#allocation8], %s1912_s15  ;;  %s324_s8 = scalar_lea.sflag [#allocation10], %s1912_s15 }
  0x4b   : > { %s1923_s1 = scalar_lea.vmem [#allocation9], %s1289_s30 }
  0x4c   : > { %1625 = dma.done.wait (%p1841_p5), %s324_s8, 2048  }
  0x4d   : > { %1627 = vsyncadd (%p1841_p5), %s324_s8, 4294965248  ;;  %s1929_s10 = scalar_lea.vmem [#allocation11], %s1288_s0  ;;  %p1292_p4 = scmp.ne.s32.totalorder %s1658_s24, 0 }
  0x4f   : > { %373 = sbr.rel (%p1292_p4) target bundleno = 86 (0x56), region = 60 }
  0x54   : > { %v1679_v0 = vmov 0.0  }
  0x55   : > { %374 = vst [vmem:[#allocation2] sm:$0xff] %v1679_v0 }
  0x56 PF: > { %v391_v1 = vld [vmem:[%s1915_s4 + $0x78] sm:$0xff]  ;;  %v390_v2 = vld [vmem:[%s1915_s4 + $0x70] sm:$0xff]  ;;  %v389_v3 = vld [vmem:[%s1915_s4 + $0x68] sm:$0xff]  ;;  %p1293_p7 = scmp.ne.s32.totalorder %s1658_s24, 3 }
  0x57   : > { %v1935_v4 = vand.u32 4294901760, %v391_v1  ;;  %v1937_v5 = vand.u32 4294901760, %v390_v2  ;;  %v1939_v6 = vand.u32 4294901760, %v389_v3  ;;  %v388_v7 = vld [vmem:[%s1915_s4 + $0x60] sm:$0xff]  ;;  %v387_v8 = vld [vmem:[%s1915_s4 + $0x58] sm:$0xff]  ;;  %v386_v9 = vld [vmem:[%s1915_s4 + $0x50] sm:$0xff] }
  0x58   : > { %v1944_v10 = vand.u32 4294901760, %v388_v7  ;;  %v1946_v11 = vand.u32 4294901760, %v387_v8  ;;  %v1948_v12 = vand.u32 4294901760, %v386_v9  ;;  %v385_v13 = vld [vmem:[%s1915_s4 + $0x48] sm:$0xff]  ;;  %v384_v14 = vld [vmem:[%s1915_s4 + $0x40] sm:$0xff]  ;;  %v383_v22 = vld [vmem:[%s1915_s4 + $0x38] sm:$0xff] }
  0x59   : > { %397 = vmatpush.msra.mxu0 %v1935_v4  ;;  %v1954_v15 = vsub.f32 %v391_v1, %v1935_v4  ;;  %v1957_v16 = vsub.f32 %v390_v2, %v1937_v5  ;;  %v1960_v17 = vsub.f32 %v389_v3, %v1939_v6  ;;  %v1962_v18 = vand.u32 4294901760, %v385_v13  ;;  %593 = vmatpush.msra.mxu3 %v1935_v4  ;;  %v382_v35 = vld [vmem:[%s1915_s4 + $0x30] sm:$0xff]  ;;  %v381_v36 = vld [vmem:[%s1915_s4 + $0x28] sm:$0xff]  ;;  %v380_v43 = vld [vmem:[%s1915_s4 + $0x20] sm:$0xff]  ;;  %s2526_s12 = sld [smem:[#allocation28_spill]] (!%p1293_p7) }
  0x5a   : > { %v1966_v19 = vsub.f32 %v388_v7, %v1944_v10  ;;  %v1969_v20 = vsub.f32 %v387_v8, %v1946_v11  ;;  %v1971_v21 = vand.u32 4294901760, %v384_v14  ;;  %v1979_v26 = vsub.f32 %v386_v9, %v1948_v12  ;;  %v379_v48 = vld [vmem:[%s1915_s4 + $0x18] sm:$0xff]  ;;  %v378_v54 = vld [vmem:[%s1915_s4 + $0x10] sm:$0xff]  ;;  %v377_v62 = vld [vmem:[%s1915_s4 + $0x8] sm:$0xff] }
  0x5b   : > { %399 = vmatpush.msra.mxu0 %v1937_v5  ;;  %v439_v23 = vand.u32 4294901760, %v1954_v15  ;;  %v445_v24 = vand.u32 4294901760, %v1957_v16  ;;  %v451_v25 = vand.u32 4294901760, %v1960_v17  ;;  %540 = vmatpush.msra.mxu2 %v1954_v15  ;;  %v1985_v29 = vsub.f32 %v385_v13, %v1962_v18  ;;  %v376_v3 = vld [vmem:[%s1915_s4] sm:$0xff] }
  0x5c   : > { %v457_v27 = vand.u32 4294901760, %v1966_v19  ;;  %v463_v28 = vand.u32 4294901760, %v1969_v20  ;;  %595 = vmatpush.msra.mxu3 %v1937_v5  ;;  %v1998_v33 = vand.u32 4294901760, %v383_v22  ;;  %v2002_v34 = vsub.f32 %v384_v14, %v1971_v21 }
  0x5d   : > { %v440_v30 = vsub.f32 %v1954_v15, %v439_v23  ;;  %401 = vmatpush.msra.mxu0 %v1939_v6  ;;  %v446_v31 = vsub.f32 %v1957_v16, %v445_v24  ;;  %v452_v32 = vsub.f32 %v1960_v17, %v451_v25  ;;  %543 = vmatpush.msra.mxu2 %v1957_v16  ;;  %v469_v40 = vand.u32 4294901760, %v1979_v26  ;;  %v762_v15 = vld [vmem:[%s1923_s1 + $0x78] sm:$0xff]  ;;  %v761_v16 = vld [vmem:[%s1923_s1 + $0x70] sm:$0xff] }
  0x5e   : > { %597 = vmatpush.msra.mxu3 %v1939_v6  ;;  %v458_v39 = vsub.f32 %v1966_v19, %v457_v27  ;;  %v464_v41 = vsub.f32 %v1969_v20, %v463_v28  ;;  %v475_v42 = vand.u32 4294901760, %v1985_v29  ;;  %v2020_v45 = vand.u32 4294901760, %v382_v35 }
  0x5f   : > { %v441_v37 = vand.u32 4294901760, %v440_v30  ;;  %v447_v38 = vand.u32 4294901760, %v446_v31  ;;  %403 = vmatpush.msra.mxu0 %v1944_v10  ;;  %546 = vmatpush.msra.mxu2 %v1960_v17  ;;  %v453_v44 = vand.u32 4294901760, %v452_v32  ;;  %v2023_v46 = vsub.f32 %v383_v22, %v1998_v33  ;;  %v375_v30 = vld [vmem:[%s1904_s17] sm:$0xff] }
  0x60   : > { %599 = vmatpush.msra.mxu3 %v1944_v10  ;;  %v2025_v47 = vand.u32 4294901760, %v381_v36  ;;  %v481_v49 = vand.u32 4294901760, %v2002_v34  ;;  %v459_v50 = vand.u32 4294901760, %v458_v39  ;;  %v470_v51 = vsub.f32 %v1979_v26, %v469_v40 }
  0x61   : > { %442 = vmatpush.msra.mxu1 %v441_v37  ;;  %405 = vmatpush.msra.mxu0 %v1946_v11  ;;  %v2036_v52 = vsub.f32 %v382_v35, %v2020_v45  ;;  %v2038_v53 = vand.u32 4294901760, %v380_v43  ;;  %v2041_v55 = vand.u32 4294901760, %v379_v48  ;;  %v465_v56 = vand.u32 4294901760, %v464_v41 }
  0x62   : > { %549 = vmatpush.msra.mxu2 %v1966_v19  ;;  %601 = vmatpush.msra.mxu3 %v1946_v11  ;;  %v476_v57 = vsub.f32 %v1985_v29, %v475_v42  ;;  %v487_v58 = vand.u32 4294901760, %v2023_v46  ;;  %v2051_v59 = vsub.f32 %v381_v36, %v2025_v47  ;;  %v482_v60 = vsub.f32 %v2002_v34, %v481_v49  ;;  %v758_v19 = vld [vmem:[%s1923_s1 + $0x58] sm:$0xff] }
  0x63   : > { %448 = vmatpush.msra.mxu1 %v447_v38  ;;  %407 = vmatpush.msra.mxu0 %v1948_v12  ;;  %v2056_v61 = vand.u32 4294901760, %v378_v54  ;;  %v471_v63 = vand.u32 4294901760, %v470_v51  ;;  %v493_v0 = vand.u32 4294901760, %v2036_v52  ;;  %v2064_v1 = vsub.f32 %v380_v43, %v2038_v53 }
  0x64   : > { %552 = vmatpush.msra.mxu2 %v1969_v20  ;;  %603 = vmatpush.msra.mxu3 %v1948_v12  ;;  %v2067_v2 = vsub.f32 %v379_v48, %v2041_v55  ;;  %v477_v7 = vand.u32 4294901760, %v476_v57  ;;  %v488_v8 = vsub.f32 %v2023_v46, %v487_v58  ;;  %v499_v9 = vand.u32 4294901760, %v2051_v59  ;;  %v756_v20 = vld [vmem:[%s1923_s1 + $0x48] sm:$0xff] }
  0x65   : > { %454 = vmatpush.msra.mxu1 %v453_v44  ;;  %409 = vmatpush.msra.mxu0 %v1962_v18  ;;  %v2077_v13 = vand.u32 4294901760, %v377_v62  ;;  %v483_v14 = vand.u32 4294901760, %v482_v60  ;;  %v2080_v22 = vsub.f32 %v378_v54, %v2056_v61  ;;  %v494_v31 = vsub.f32 %v2036_v52, %v493_v0 }
  0x66   : > { %555 = vmatpush.msra.mxu2 %v1979_v26  ;;  %605 = vmatpush.msra.mxu3 %v1962_v18  ;;  %v505_v32 = vand.u32 4294901760, %v2064_v1  ;;  %v2090_v35 = vand.u32 4294901760, %v376_v3  ;;  %v2092_v36 = vand.u32 4294901760, %v375_v30  ;;  %v511_v37 = vand.u32 4294901760, %v2067_v2 }
  0x67   : > { %460 = vmatpush.msra.mxu1 %v459_v50  ;;  %411 = vmatpush.msra.mxu0 %v1971_v21  ;;  %v489_v38 = vand.u32 4294901760, %v488_v8  ;;  %v500_v39 = vsub.f32 %v2051_v59, %v499_v9  ;;  %v2102_v41 = vsub.f32 %v377_v62, %v2077_v13  ;;  %v495_v44 = vand.u32 4294901760, %v494_v31 }
  0x68   : > { %558 = vmatpush.msra.mxu2 %v1985_v29  ;;  %607 = vmatpush.msra.mxu3 %v1971_v21  ;;  %v429_v43 = vsub.f32 %v375_v30, %v2092_v36  ;;  %v506_v48 = vsub.f32 %v2064_v1, %v505_v32  ;;  %v517_v50 = vand.u32 4294901760, %v2080_v22  ;;  %v2113_v51 = vsub.f32 %v376_v3, %v2090_v35 }
  0x69   : > { %466 = vmatpush.msra.mxu1 %v465_v56  ;;  %413 = vmatpush.msra.mxu0 %v1998_v33  ;;  %v501_v54 = vand.u32 4294901760, %v500_v39  ;;  %v512_v56 = vsub.f32 %v2067_v2, %v511_v37  ;;  %v523_v57 = vand.u32 4294901760, %v2102_v41  ;;  %v2158_v17 = vand.u32 4294901760, %v762_v15 }
  0x6a   : > { %561 = vmatpush.msra.mxu2 %v2002_v34  ;;  %609 = vmatpush.msra.mxu3 %v1998_v33  ;;  %v430_v60 = vand.u32 4294901760, %v429_v43  ;;  %v507_v62 = vand.u32 4294901760, %v506_v48  ;;  %v529_v3 = vand.u32 4294901760, %v2113_v51  ;;  %v2195_v26 = vand.u32 4294901760, %v756_v20 }
  0x6b   : > { %472 = vmatpush.msra.mxu1 %v471_v63  ;;  %415 = vmatpush.msra.mxu0 %v2020_v45  ;;  %v518_v63 = vsub.f32 %v2080_v22, %v517_v50  ;;  %v524_v8 = vsub.f32 %v2102_v41, %v523_v57 }
  0x6c   : > { %564 = vmatpush.msra.mxu2 %v2023_v46  ;;  %611 = vmatpush.msra.mxu3 %v2020_v45  ;;  %v530_v31 = vsub.f32 %v2113_v51, %v529_v3 }
  0x6d   : > { %478 = vmatpush.msra.mxu1 %v477_v7  ;;  %417 = vmatpush.msra.mxu0 %v2025_v47  ;;  %v513_v7 = vand.u32 4294901760, %v512_v56  ;;  %v519_v30 = vand.u32 4294901760, %v518_v63 }
  0x6e   : > { %567 = vmatpush.msra.mxu2 %v2036_v52  ;;  %613 = vmatpush.msra.mxu3 %v2025_v47 }
  0x6f   : > { %484 = vmatpush.msra.mxu1 %v483_v14  ;;  %419 = vmatpush.msra.mxu0 %v2038_v53  ;;  %v431_v14 = vsub.f32 %v429_v43, %v430_v60 }
  0x70   : > { %570 = vmatpush.msra.mxu2 %v2051_v59  ;;  %615 = vmatpush.msra.mxu3 %v2038_v53 }
  0x71   : > { %490 = vmatpush.msra.mxu1 %v489_v38  ;;  %421 = vmatpush.msra.mxu0 %v2041_v55  ;;  %v525_v38 = vand.u32 4294901760, %v524_v8  ;;  %v432_v39 = vand.u32 4294901760, %v431_v14 }
  0x72   : > { %573 = vmatpush.msra.mxu2 %v2064_v1  ;;  %617 = vmatpush.msra.mxu3 %v2041_v55 }
  0x73   : > { %496 = vmatpush.msra.mxu1 %v495_v44  ;;  %423 = vmatpush.msra.mxu0 %v2056_v61  ;;  %v531_v44 = vand.u32 4294901760, %v530_v31 }
  0x74   : > { %576 = vmatpush.msra.mxu2 %v2067_v2  ;;  %619 = vmatpush.msra.mxu3 %v2056_v61 }
  0x75   : > { %502 = vmatpush.msra.mxu1 %v501_v54  ;;  %425 = vmatpush.msra.mxu0 %v2077_v13  ;;  %v2170_v54 = vand.u32 4294901760, %v758_v19 }
  0x76   : > { %579 = vmatpush.msra.mxu2 %v2080_v22  ;;  %621 = vmatpush.msra.mxu3 %v2077_v13 }
  0x77   : > { %508 = vmatpush.msra.mxu1 %v507_v62  ;;  %427 = vmatpush.msra.mxu0 %v2090_v35  ;;  %v755_v62 = vld [vmem:[%s1923_s1 + $0x40] sm:$0xff] }
  0x78   : > { %582 = vmatpush.msra.mxu2 %v2102_v41  ;;  %623 = vmatpush.msra.mxu3 %v2090_v35  ;;  %v2208_v31 = vand.u32 4294901760, %v755_v62 }
  0x79   : > { %634 = vmatpush.msrb.mxu0 %v439_v23  ;;  %514 = vmatpush.msra.mxu1 %v513_v7  ;;  %v760_v23 = vld [vmem:[%s1923_s1 + $0x68] sm:$0xff] }
  0x7a   : > { %585 = vmatpush.msra.mxu2 %v2113_v51  ;;  %627 = vmatmul.f32.vlgmr.msra.gmra.mxu3 %v430_v60 }
  0x7b   : > { %638 = vmatpush.msrb.mxu0 %v445_v24  ;;  %520 = vmatpush.msra.mxu1 %v519_v30  ;;  %v2160_v24 = vand.u32 4294901760, %v761_v16 }
  0x7c   : > { %588 = vmatmul.f32.vlgmr.msra.gmra.mxu2 %v429_v43  ;;  %433 = vmatmul.f32.vlgmr.msra.gmra.mxu0 %v432_v39  ;;  %v759_v43 = vld [vmem:[%s1923_s1 + $0x60] sm:$0xff] }
  0x7d   : > { %642 = vmatpush.msrb.mxu0 %v451_v25  ;;  %526 = vmatpush.msra.mxu1 %v525_v38  ;;  %v2162_v25 = vand.u32 4294901760, %v760_v23  ;;  %v2168_v48 = vand.u32 4294901760, %v759_v43  ;;  %v2182_v56 = vsub.f32 %v761_v16, %v2160_v24 }
  0x7e   : > { %764 = vmatpush.msrb.mxu2 %v2158_v17 }
  0x7f   : > { %646 = vmatpush.msrb.mxu0 %v457_v27  ;;  %532 = vmatpush.msra.mxu1 %v531_v44  ;;  %v757_v27 = vld [vmem:[%s1923_s1 + $0x50] sm:$0xff]  ;;  %v2185_v60 = vsub.f32 %v760_v23, %v2162_v25  ;;  %v2189_v63 = vsub.f32 %v759_v43, %v2168_v48  ;;  %v812_v7 = vand.u32 4294901760, %v2182_v56 }
  0x80   : > { %534 = vmatmul.f32.vlgmr.msra.gmra.mxu1 %v2092_v36  ;;  %766 = vmatpush.msrb.mxu2 %v2160_v24 }
  0x81   : > { %701 = vmatpush.msrb.mxu1 %v1935_v4  ;;  %650 = vmatpush.msrb.mxu0 %v463_v28  ;;  %v2172_v4 = vand.u32 4294901760, %v757_v27  ;;  %v2179_v28 = vsub.f32 %v762_v15, %v2158_v17  ;;  %v818_v8 = vand.u32 4294901760, %v2185_v60  ;;  %v824_v14 = vand.u32 4294901760, %v2189_v63 }
  0x82   : > { %v813_v29 = vsub.f32 %v2182_v56, %v812_v7  ;;  %768 = vmatpush.msrb.mxu2 %v2162_v25  ;;  %v2236_v15 = vsub.f32 %v755_v62, %v2208_v31 }
  0x83   : > { %703 = vmatpush.msrb.mxu1 %v1937_v5  ;;  %654 = vmatpush.msrb.mxu0 %v469_v40  ;;  %v2193_v5 = vsub.f32 %v758_v19, %v2170_v54  ;;  %v806_v40 = vand.u32 4294901760, %v2179_v28  ;;  %v2206_v30 = vsub.f32 %v757_v27, %v2172_v4  ;;  %v825_v39 = vsub.f32 %v2189_v63, %v824_v14 }
  0x84   : > { %770 = vmatpush.msrb.mxu2 %v2168_v48 }
  0x85   : > { %705 = vmatpush.msrb.mxu1 %v1939_v6  ;;  %658 = vmatpush.msrb.mxu0 %v475_v42  ;;  %v807_v6 = vsub.f32 %v2179_v28, %v806_v40  ;;  %v819_v42 = vsub.f32 %v2185_v60, %v818_v8  ;;  %v830_v38 = vand.u32 4294901760, %v2193_v5  ;;  %v836_v44 = vand.u32 4294901760, %v2206_v30 }
  0x86   : > { %772 = vmatpush.msrb.mxu2 %v2170_v54 }
  0x87   : > { %707 = vmatpush.msrb.mxu1 %v1944_v10  ;;  %662 = vmatpush.msrb.mxu0 %v481_v49  ;;  %v2225_v10 = vsub.f32 %v756_v20, %v2195_v26  ;;  %v808_v34 = vand.u32 4294901760, %v807_v6  ;;  %v814_v49 = vand.u32 4294901760, %v813_v29  ;;  %v831_v46 = vsub.f32 %v2193_v5, %v830_v38  ;;  %v750_v6 = vld [vmem:[%s1923_s1 + $0x18] sm:$0xff] }
  0x88   : > { %v837_v52 = vsub.f32 %v2206_v30, %v836_v44  ;;  %774 = vmatpush.msrb.mxu2 %v2172_v4  ;;  %v2352_v29 = vand.u32 4294901760, %v750_v6 }
  0x89   : > { %709 = vmatpush.msrb.mxu1 %v1946_v11  ;;  %666 = vmatpush.msrb.mxu0 %v487_v58  ;;  %v820_v11 = vand.u32 4294901760, %v819_v42  ;;  %v842_v58 = vand.u32 4294901760, %v2225_v10  ;;  %v749_v42 = vld [vmem:[%s1923_s1 + $0x10] sm:$0xff] }
  0x8a   : > { %809 = vmatpush.msrb.mxu3 %v808_v34  ;;  %776 = vmatpush.msrb.mxu2 %v2195_v26  ;;  %v2356_v34 = vsub.f32 %v750_v6, %v2352_v29 }
  0x8b   : > { %711 = vmatpush.msrb.mxu1 %v1948_v12  ;;  %670 = vmatpush.msrb.mxu0 %v493_v0  ;;  %v826_v12 = vand.u32 4294901760, %v825_v39  ;;  %v848_v0 = vand.u32 4294901760, %v2236_v15  ;;  %v843_v59 = vsub.f32 %v2225_v10, %v842_v58  ;;  %v748_v39 = vld [vmem:[%s1923_s1 + $0x8] sm:$0xff] }
  0x8c   : > { %815 = vmatpush.msrb.mxu3 %v814_v49  ;;  %778 = vmatpush.msrb.mxu2 %v2208_v31  ;;  %v2358_v49 = vand.u32 4294901760, %v749_v42 }
  0x8d   : > { %713 = vmatpush.msrb.mxu1 %v1962_v18  ;;  %674 = vmatpush.msrb.mxu0 %v499_v9  ;;  %v832_v18 = vand.u32 4294901760, %v831_v46  ;;  %v838_v9 = vand.u32 4294901760, %v837_v52  ;;  %v844_v1 = vand.u32 4294901760, %v843_v59  ;;  %v747_v52 = vld [vmem:[%s1923_s1] sm:$0xff] }
  0x8e   : > { %821 = vmatpush.msrb.mxu3 %v820_v11  ;;  %v878_v11 = vand.u32 4294901760, %v2356_v34  ;;  %v883_v46 = vsub.f32 %v749_v42, %v2358_v49 }
  0x8f   : > { %715 = vmatpush.msrb.mxu1 %v1971_v21  ;;  %678 = vmatpush.msrb.mxu0 %v505_v32  ;;  %v849_v21 = vsub.f32 %v2236_v15, %v848_v0 }
  0x90   : > { %827 = vmatpush.msrb.mxu3 %v826_v12  ;;  %v2365_v12 = vand.u32 4294901760, %v748_v39  ;;  %v884_v59 = vand.u32 4294901760, %v883_v46 }
  0x91   : > { %717 = vmatpush.msrb.mxu1 %v1998_v33  ;;  %682 = vmatpush.msrb.mxu0 %v511_v37  ;;  %v850_v33 = vand.u32 4294901760, %v849_v21  ;;  %v2373_v21 = vand.u32 4294901760, %v747_v52 }
  0x92   : > { %833 = vmatpush.msrb.mxu3 %v832_v18  ;;  %v879_v18 = vsub.f32 %v2356_v34, %v878_v11 }
  0x93   : > { %719 = vmatpush.msrb.mxu1 %v2020_v45  ;;  %686 = vmatpush.msrb.mxu0 %v517_v50  ;;  %v754_v45 = vld [vmem:[%s1923_s1 + $0x38] sm:$0xff] }
  0x94   : > { %839 = vmatpush.msrb.mxu3 %v838_v9  ;;  %v889_v9 = vsub.f32 %v748_v39, %v2365_v12 }
  0x95   : > { %721 = vmatpush.msrb.mxu1 %v2025_v47  ;;  %690 = vmatpush.msrb.mxu0 %v523_v57  ;;  %v2300_v47 = vand.u32 4294901760, %v754_v45 }
  0x96   : > { %845 = vmatpush.msrb.mxu3 %v844_v1  ;;  %v880_v1 = vand.u32 4294901760, %v879_v18 }
  0x97   : > { %723 = vmatpush.msrb.mxu1 %v2038_v53  ;;  %694 = vmatpush.msrb.mxu0 %v529_v3  ;;  %v2303_v53 = vsub.f32 %v754_v45, %v2300_v47  ;;  %v890_v45 = vand.u32 4294901760, %v889_v9 }
  0x98   : > { %696 = vmatmul.f32.vlgmr.msrb.gmra.mxu0 %v2092_v36  ;;  %851 = vmatpush.msrb.mxu3 %v850_v33  ;;  %v885_v33 = vsub.f32 %v883_v46, %v884_v59 }
  0x99   : > { %725 = vmatpush.msrb.mxu1 %v2041_v55  ;;  %907 = vmatpush.msra.mxu0 %v2179_v28  ;;  %v753_v55 = vld [vmem:[%s1923_s1 + $0x30] sm:$0xff] }
  0x9a   : > { %780 = vmatpush.msrb.mxu2 %v2300_v47  ;;  %v2309_v2 = vand.u32 4294901760, %v753_v55 }
  0x9b   : > { %727 = vmatpush.msrb.mxu1 %v2056_v61  ;;  %910 = vmatpush.msra.mxu0 %v2182_v56  ;;  %v854_v61 = vand.u32 4294901760, %v2303_v53  ;;  %v1420_v56 = vld [vmem:[%s317_s7] ss:$0 sm:$0xff] }
  0x9c   : > { %v2317_v32 = vsub.f32 %v753_v55, %v2309_v2  ;;  %782 = vmatpush.msrb.mxu2 %v2309_v2  ;;  %v895_v55 = vsub.f32 %v747_v52, %v2373_v21 }
  0x9d   : > { %729 = vmatpush.msrb.mxu1 %v2077_v13  ;;  %913 = vmatpush.msra.mxu0 %v2185_v60  ;;  %v752_v13 = vld [vmem:[%s1923_s1 + $0x28] sm:$0xff]  ;;  %v855_v22 = vsub.f32 %v2303_v53, %v854_v61 }
  0x9e   : > { %v860_v41 = vand.u32 4294901760, %v2317_v32 }
  0x9f   : > { %731 = vmatpush.msrb.mxu1 %v2090_v35  ;;  %916 = vmatpush.msra.mxu0 %v2189_v63  ;;  %v2319_v35 = vand.u32 4294901760, %v752_v13  ;;  %v856_v37 = vand.u32 4294901760, %v855_v22  ;;  %v891_v22 = vsub.f32 %v889_v9, %v890_v45 }
  0xa0   : > { %733 = vmatmul.f32.vlgmr.msrb.gmra.mxu1 %v2092_v36  ;;  %v751_v36 = vld [vmem:[%s1923_s1 + $0x20] sm:$0xff]  ;;  %v861_v57 = vsub.f32 %v2317_v32, %v860_v41 }
  0xa1   : > { %960 = vmatpush.msra.mxu1 %v2158_v17  ;;  %919 = vmatpush.msra.mxu0 %v2193_v5  ;;  %v2326_v50 = vsub.f32 %v752_v13, %v2319_v35  ;;  %v2328_v51 = vand.u32 4294901760, %v751_v36  ;;  %v886_v13 = vand.u32 4294901760, %v885_v33 }
  0xa2   : > { %784 = vmatpush.msrb.mxu2 %v2319_v35  ;;  %857 = vmatpush.msrb.mxu3 %v856_v37  ;;  %v862_v23 = vand.u32 4294901760, %v861_v57  ;;  %v892_v37 = vand.u32 4294901760, %v891_v22 }
  0xa3   : > { %962 = vmatpush.msra.mxu1 %v2160_v24  ;;  %922 = vmatpush.msra.mxu0 %v2206_v30  ;;  %v866_v3 = vand.u32 4294901760, %v2326_v50  ;;  %v2338_v16 = vsub.f32 %v751_v36, %v2328_v51  ;;  %v896_v36 = vand.u32 4294901760, %v895_v55 }
  0xa4   : > { %786 = vmatpush.msrb.mxu2 %v2328_v51  ;;  %863 = vmatpush.msrb.mxu3 %v862_v23 }
  0xa5   : > { %964 = vmatpush.msra.mxu1 %v2162_v25  ;;  %925 = vmatpush.msra.mxu0 %v2225_v10  ;;  %v867_v43 = vsub.f32 %v2326_v50, %v866_v3  ;;  %v872_v19 = vand.u32 4294901760, %v2338_v16  ;;  %v897_v57 = vsub.f32 %v895_v55, %v896_v36 }
  0xa6   : > { %788 = vmatpush.msrb.mxu2 %v2352_v29 }
  0xa7   : > { %966 = vmatpush.msra.mxu1 %v2168_v48  ;;  %928 = vmatpush.msra.mxu0 %v2236_v15  ;;  %v868_v27 = vand.u32 4294901760, %v867_v43  ;;  %v873_v20 = vsub.f32 %v2338_v16, %v872_v19  ;;  %v898_v28 = vand.u32 4294901760, %v897_v57 }
  0xa8   : > { %790 = vmatpush.msrb.mxu2 %v2358_v49 }
  0xa9   : > { %968 = vmatpush.msra.mxu1 %v2170_v54  ;;  %931 = vmatpush.msra.mxu0 %v2303_v53  ;;  %v874_v62 = vand.u32 4294901760, %v873_v20 }
  0xaa   : > { %869 = vmatpush.msrb.mxu3 %v868_v27  ;;  %792 = vmatpush.msrb.mxu2 %v2365_v12  ;;  %v746_v27 = vld [vmem:[#allocation2] sm:$0xff] }
  0xab   : > { %970 = vmatpush.msra.mxu1 %v2172_v4  ;;  %934 = vmatpush.msra.mxu0 %v2317_v32 }
  0xac   : > { %875 = vmatpush.msrb.mxu3 %v874_v62  ;;  %794 = vmatpush.msrb.mxu2 %v2373_v21 }
  0xad   : > { %972 = vmatpush.msra.mxu1 %v2195_v26  ;;  %937 = vmatpush.msra.mxu0 %v2326_v50 }
  0xae   : > { %1001 = vmatpush.msra.mxu2 %v806_v40  ;;  %881 = vmatpush.msrb.mxu3 %v880_v1 }
  0xaf   : > { %974 = vmatpush.msra.mxu1 %v2208_v31  ;;  %940 = vmatpush.msra.mxu0 %v2338_v16 }
  0xb0   : > { %1005 = vmatpush.msra.mxu2 %v812_v7  ;;  %887 = vmatpush.msrb.mxu3 %v886_v13 }
  0xb1   : > { %976 = vmatpush.msra.mxu1 %v2300_v47  ;;  %943 = vmatpush.msra.mxu0 %v2356_v34 }
  0xb2   : > { %1009 = vmatpush.msra.mxu2 %v818_v8  ;;  %893 = vmatpush.msrb.mxu3 %v892_v37 }
  0xb3   : > { %978 = vmatpush.msra.mxu1 %v2309_v2  ;;  %946 = vmatpush.msra.mxu0 %v883_v46 }
  0xb4   : > { %1013 = vmatpush.msra.mxu2 %v824_v14  ;;  %899 = vmatpush.msrb.mxu3 %v898_v28 }
  0xb5   : > { %980 = vmatpush.msra.mxu1 %v2319_v35  ;;  %949 = vmatpush.msra.mxu0 %v889_v9 }
  0xb6   : > { %1068 = vmatpush.msra.mxu3 %v2158_v17  ;;  %1017 = vmatpush.msra.mxu2 %v830_v38 }
  0xb7   : > { %982 = vmatpush.msra.mxu1 %v2328_v51  ;;  %952 = vmatpush.msra.mxu0 %v895_v55 }
  0xb8   : > { %1070 = vmatpush.msra.mxu3 %v2160_v24  ;;  %1021 = vmatpush.msra.mxu2 %v836_v44 }
  0xb9   : > { %984 = vmatpush.msra.mxu1 %v2352_v29 }
  0xba   : > { %1072 = vmatpush.msra.mxu3 %v2162_v25  ;;  %1025 = vmatpush.msra.mxu2 %v842_v58 }
  0xbb   : > { %986 = vmatpush.msra.mxu1 %v2358_v49 }
  0xbc   : > { %1074 = vmatpush.msra.mxu3 %v2168_v48  ;;  %1029 = vmatpush.msra.mxu2 %v848_v0 }
  0xbd   : > { %988 = vmatpush.msra.mxu1 %v2365_v12 }
  0xbe   : > { %1076 = vmatpush.msra.mxu3 %v2170_v54  ;;  %1033 = vmatpush.msra.mxu2 %v854_v61 }
  0xbf   : > { %990 = vmatpush.msra.mxu1 %v2373_v21 }
  0xc0   : > { %1078 = vmatpush.msra.mxu3 %v2172_v4  ;;  %1037 = vmatpush.msra.mxu2 %v860_v41 }
  0xc2   : > { %1080 = vmatpush.msra.mxu3 %v2195_v26  ;;  %1041 = vmatpush.msra.mxu2 %v866_v3 }
  0xc4   : > { %1082 = vmatpush.msra.mxu3 %v2208_v31  ;;  %1045 = vmatpush.msra.mxu2 %v872_v19 }
  0xc6   : > { %1084 = vmatpush.msra.mxu3 %v2300_v47  ;;  %1049 = vmatpush.msra.mxu2 %v878_v11 }
  0xc8   : > { %1086 = vmatpush.msra.mxu3 %v2309_v2  ;;  %1053 = vmatpush.msra.mxu2 %v884_v59 }
  0xca   : > { %1088 = vmatpush.msra.mxu3 %v2319_v35  ;;  %1057 = vmatpush.msra.mxu2 %v890_v45 }
  0xcc   : > { %1090 = vmatpush.msra.mxu3 %v2328_v51  ;;  %1061 = vmatpush.msra.mxu2 %v896_v36 }
  0xce   : > { %1092 = vmatpush.msra.mxu3 %v2352_v29 }
  0xd0   : > { %1094 = vmatpush.msra.mxu3 %v2358_v49 }
  0xd2   : > { %1096 = vmatpush.msra.mxu3 %v2365_v12 }
  0xd4   : > { %1098 = vmatpush.msra.mxu3 %v2373_v21 }
  0xf9   : > { %v434_v60 = vpop.f32.mrf.mxu0 }
  0xfa   : > { %v435_v17 = vadd.f32 %v1420_v56, %v434_v60 }
  0xfd   : > { %v535_v24 = vpop.f32.mrf.mxu1  ;;  %v628_v4 = vpop.f32.mrf.mxu3 }
  0xfe   : > { %v536_v25 = vadd.f32 %v535_v24, %v435_v17 }
  0xff   : > { %v589_v48 = vpop.f32.mrf.mxu2 }
 0x100   : > { %v590_v54 = vadd.f32 %v589_v48, %v536_v25 }
 0x102   : > { %v629_v63 = vadd.f32 %v628_v4, %v590_v54 }
 0x115   : > { %v697_v5 = vpop.f32.mrf.mxu0 }
 0x116   : > { %v698_v26 = vadd.f32 %v697_v5, %v629_v63 }
 0x11d   : > { %v734_v40 = vpop.f32.mrf.mxu1 }
 0x11e   : > { %v735_v7 = vadd.f32 %v734_v40, %v698_v26 }
 0x120   : > { %v737_v8 = vmul.f32 %v735_v7, %v735_v7 }
 0x122   : > { %v738_v14 = vmul.f32 %v737_v8, %v735_v7 }
 0x124   : > { %v739_v30 = vmul.f32 0.044715, %v738_v14 }
 0x126   : > { %v740_v31 = vadd.f32 %v739_v30, %v735_v7 }
 0x128   : > { %v741_v38 = vmul.f32 0.7978846, %v740_v31 }
 0x12a   : > { %1421 = vtanh.f32 %v741_v38 }
 0x130   : > { %v1422_v10 = vpop.eup %1421 }
 0x131   : > { %v743_v44 = vadd.f32 1.0, %v1422_v10 }
 0x133   : > { %v744_v15 = vmul.f32 0.5, %v743_v44 }
 0x135   : > { %v745_v58 = vmul.f32 %v744_v15, %v735_v7 }
 0x137   : > { %v795_v0 = vand.u32 4294901760, %v745_v58 }
 0x139   : > { %901 = vmatmul.f32.vlgmr.msrb.gmra.mxu3 %v795_v0  ;;  %v796_v47 = vsub.f32 %v745_v58, %v795_v0 }
 0x13b   : > { %955 = vmatmul.f32.vlgmr.msra.gmra.mxu0 %v796_v47  ;;  %v797_v53 = vand.u32 4294901760, %v796_v47 }
 0x13d   : > { %994 = vmatmul.f32.vlgmr.msra.gmra.mxu1 %v797_v53  ;;  %v798_v61 = vsub.f32 %v796_v47, %v797_v53 }
 0x13f   : > { %v799_v2 = vand.u32 4294901760, %v798_v61 }
 0x141   : > { %800 = vmatmul.f32.vlgmr.msrb.gmra.mxu2 %v799_v2  ;;  %1100 = vmatmul.f32.vlgmr.msra.gmra.mxu3 %v795_v0 }
 0x149   : > { %1063 = vmatmul.f32.vlgmr.msra.gmra.mxu2 %v795_v0 }
 0x1b8   : > { %v956_v50 = vpop.f32.mrf.mxu0 }
 0x1ba   : > { %v995_v3 = vpop.f32.mrf.mxu1 }
 0x1bc   : > { %v902_v32 = vpop.f32.mrf.mxu3 }
 0x1c4   : > { %v801_v35 = vpop.f32.mrf.mxu2  ;;  %v1101_v19 = vpop.f32.mrf.mxu3 }
 0x1c5   : > { %v903_v41 = vadd.f32 %v902_v32, %v801_v35 }
 0x1c7   : > { %v957_v51 = vadd.f32 %v956_v50, %v903_v41 }
 0x1c9   : > { %v996_v16 = vadd.f32 %v995_v3, %v957_v51 }
 0x1cc   : > { %v1064_v23 = vpop.f32.mrf.mxu2 }
 0x1cd   : > { %v1065_v43 = vadd.f32 %v1064_v23, %v996_v16 }
 0x1cf   : > { %v1102_v20 = vadd.f32 %v1101_v19, %v1065_v43  ;;  %1109 = sbr.rel (%p1293_p7) target bundleno = 478 (0x1de), region = 64 }
 0x1d1   : > { %v1104_v62 = vadd.f32 %v1102_v20, %v746_v27 }
 0x1d3   : > { %1105 = vst [vmem:[#allocation2] sm:$0xff] %v1104_v62 }
 0x1d4   : > { %v1423_v29 = vld [vmem:[%s2526_s12] ss:$0 sm:$0xff] }
 0x1da   : > { %v1110_v6 = vld [vmem:[#allocation2] sm:$0xff] }
 0x1db   : > { %v1115_v42 = vadd.f32 %v1423_v29, %v1110_v6 }
 0x1dd   : > { %1116 = vst [vmem:[%s1929_s10] sm:$0xff] %v1115_v42 }
 0x1de PF: > { %s2527_s14 = sld [smem:[#allocation19_spill]]  ;;  %s1130_s24 = sshll.u32 %s1929_s10, 4  ;;  %s1131_s24 = int_to_ptr.vmem [resolvable:$true] %s1130_s24 }
 0x1df   : > { %s2528_s20 = sld [smem:[#allocation29_spill]]  ;;  %s1118_s21 = scalar_lea.sflag [#allocation5], %s1900_s16 }
 0x1e4   : > { %s1295_s11 = sshll.u32 %s2527_s14, 3 }
 0x1e5   : > { %s2529_s13 = smov %s2528_s20  ;;  %s1128_s23 = scalar_lea.hbm %s2528_s20, %s1295_s11 }
 0x1e6   : > { %s1132_s0 = sshll.u32 %s1128_s23, 4  ;;  %s1564_s9 = scalar_lea.hbm %s2529_s13, 16  ;;  %s1133_s0 = int_to_ptr.hbm [resolvable:$true] %s1132_s0 }
 0x1e7   : > { %s1558_s17 = sshra.s32 %s1133_s0, 4  ;;  %s1559_s17 = int_to_ptr.hbm [resolvable:$true] %s1558_s17 }
 0x1e8   : > { %s1560_s6 = scalar_lea.hbm %s1559_s17, 8  ;;  %p1565_p3 = scmp.lt.s32.totalorder %s1559_s17, %s2529_s13 }
 0x1e9   : > { %p1561_p10 = scmp.ne.s32.totalorder %s1559_s17, %s1560_s6  ;;  %p1566_p0 = scmp.lt.s32.totalorder %s1564_s9, %s1560_s6 }
 0x1eb   : > { %p1562_p11 = pnand %p1561_p10, %p1857_p12  ;;  %p1567_p5 = por %p1566_p0, %p1565_p3 }
 0x1ed   : > { %p1563_p1 = pneg %p1562_p11 }
 0x1ef   : > { %p1568_p6 = pnand %p1567_p5, %p1563_p1 }
 0x1f1   : > { %1571 = shalt.err (!%p1568_p6)
}
 0x1f2   : > { %1307 = dma.vmem_to_hbm [thread:$0]  (%p1857_p12), %s1131_s24, 128, %s1133_s0, %s1118_s21  }
 0x1f3 PF: > { %s2530_s16 = sld [smem:[#allocation17_spill]]  ;;  %p1327_p8 = scmp.ge.s32.totalorder %s1674_s28, 2 }
 0x1f5   : > { %p1323_p9 = pnand %p1327_p8, %p1866_p13 }
 0x1f7   : > { %p1324_p2 = pneg %p1323_p9 }
 0x1f9   : > { %s1144_s1 = sand.u32 1, %s2530_s16  }
 0x1fa   : > { %s1145_s10 = scalar_lea.sflag [#allocation5], %s1144_s1 }
 0x1fb   : > { %1629 = dma.done.wait (%p1324_p2), %s1145_s10, 128  }
 0x1fc   : > { %1631 = vsyncadd (%p1324_p2), %s1145_s10, 4294967168  ;;  %s27_s28 = sadd.s32 1, %s1674_s28   ;;  %s2532_s29 = sld [smem:[#allocation16_spill]] }
 0x1fd   : > { %p24_p4 = scmp.ge.s32.totalorder %s27_s28, 10   ;;  %s2533_s20 = sld [smem:[#allocation23_spill]] }
 0x1fe   : > { %s2534_s5 = sld [smem:[#allocation18_spill]]  ;;  %s2539_s18 = smov %s1638_s19 }
 0x1ff   : > { %s2535_s23 = sld [smem:[#allocation24_spill]]  ;;  %s2541_s21 = smov %s1650_s22 }
 0x200   : > { %s2536_s25 = sld [smem:[#allocation20_spill]]  ;;  %s2543_s24 = smov %s1666_s26 }
 0x201   : > { %s2537_s12 = sld [smem:[#allocation21_spill]] }
 0x202   : > { %s2538_s27 = sld [smem:[#allocation22_spill]]  ;;  %s2540_s19 = smov %s2532_s29 }
 0x203   :  { %26 = sbr.rel (!%p24_p4) target bundleno = 18 (0x12), region = 130 }
 0x204   : > { %s2542_s22 = smov %s2534_s5 }
 0x207   : > { %s2544_s26 = smov %s2537_s12 }
 0x208   :  { %1151 = vsyncpa [#allocation4], 1 }
 0x209   :  { %1153 = vsyncpa [#allocation4 + $0x1], 1 }
 0x20a   :  { %1154 = vsyncpa [#allocation7], 1 }
 0x20b   :  { %1156 = vsyncpa [#allocation7 + $0x1], 1 }
 0x20c   :  { %1157 = vsyncpa [#allocation10], 1 }
 0x20d   :  { %1159 = vsyncpa [#allocation10 + $0x1], 1 }
 0x20e   :  { %1160 = vsyncpa [#allocation5], 1 }
 0x20f   :  { %1162 = vsyncpa [#allocation5 + $0x1], 1 }

</bundles_post_ra>
